<compile_context>
chip_gen: v7x
topology: tpu7x:2x2x1
jax: 0.10.0
libtpu: 0.0.40
codegen_flags: <defaults>
</compile_context>

<pallas_src>
from typing import NamedTuple

import jax
import jax.numpy as jnp
from jax.experimental import pallas as pl
from jax.experimental.pallas import tpu as pltpu


def _round_up(x, m):
    return (x + m - 1) // m * m


class GatedTransParams(NamedTuple):
    w_pack: jax.Array   # [in_dim, n_j * 2 * tn], per column tile: [Wy_j | Wg_j]
    b_pack: jax.Array   # [1,       n_j * 2 * tn], per column tile: [by_j | bg_j]
    in_dim: int
    out_dim: int
    out_p: int          # padded out_dim (multiple of 64, or of tn if tiled)
    tn: int             # output-column tile
    n_j: int            # number of column tiles


def pack_gated_trans_params(wy, by, wg, bg, *, max_tile_n=512, param_dtype=None):
    """Pack (Wy, by, Wg, bg) ONCE; wy/wg: [in_dim, out_dim], by/bg: [out_dim].

    Call this outside the step function and reuse the result: under jit the
    pad/reshape/concat would otherwise cost a weight-sized HBM round trip on
    every forward call.  Pass param_dtype=jnp.bfloat16 for a bf16 weight path
    (accumulation stays f32 in the kernel).
    """
    in_dim, out_dim = wy.shape
    max_tile_n = max(128, (int(max_tile_n) // 128) * 128)

    # Pad out_dim only to a multiple of 64 so the packed [Wy|Wg] width 2*tn is
    # a lane-dense multiple of 128; only when several column tiles are needed
    # must tn itself be a 128-multiple.
    out_p = _round_up(out_dim, 64)
    if out_p <= max_tile_n:
        tn, n_j = out_p, 1
    else:
        tn = max_tile_n
        out_p = _round_up(out_dim, tn)
        n_j = out_p // tn

    if param_dtype is None:
        param_dtype = wy.dtype

    pad_w = ((0, 0), (0, out_p - out_dim))
    wy_t = jnp.pad(wy, pad_w).astype(param_dtype).reshape(in_dim, n_j, tn)
    wg_t = jnp.pad(wg, pad_w).astype(param_dtype).reshape(in_dim, n_j, tn)
    w_pack = jnp.concatenate([wy_t, wg_t], axis=2).reshape(in_dim, n_j * 2 * tn)

    by_t = jnp.pad(by, (0, out_p - out_dim)).astype(param_dtype).reshape(n_j, tn)
    bg_t = jnp.pad(bg, (0, out_p - out_dim)).astype(param_dtype).reshape(n_j, tn)
    b_pack = jnp.concatenate([by_t, bg_t], axis=1).reshape(1, n_j * 2 * tn)

    return GatedTransParams(w_pack, b_pack, in_dim, out_dim, out_p, tn, n_j)


def gated_trans_kernel(x_ref, w_ref, b_ref, o_ref):
    # x_ref: [TM, in_dim]
    # w_ref: [in_dim, 2*TN]   packed as [ Wy tile | Wg tile ]
    # b_ref: [1, 2*TN]        packed as [ by tile | bg tile ]
    # o_ref: [TM, TN]
    tn = o_ref.shape[-1]
    acc = jnp.dot(x_ref[...], w_ref[...], preferred_element_type=jnp.float32)
    acc = acc + b_ref[...].astype(jnp.float32)
    y = jnp.tanh(acc[:, :tn])
    # sigmoid(z) == 0.5 * (tanh(0.5 * z) + 1): one EUP transcendental per
    # element (EUP is a likely binding slot at small K), exact identity.
    g = 0.5 * (jnp.tanh(0.5 * acc[:, tn:]) + 1.0)
    o_ref[...] = (y * g).astype(o_ref.dtype)


def gated_trans(x, params: GatedTransParams, *, tile_m=1024, out_dtype=None,
                vmem_limit_bytes=48 * 1024 * 1024):
    """x: [..., in_dim] -> [..., out_dim] using pre-packed params."""
    w_pack, b_pack, in_dim, out_dim, out_p, tn, n_j = params
    assert x.shape[-1] == in_dim
    lead = x.shape[:-1]
    if out_dtype is None:
        out_dtype = x.dtype

    x2d = x.reshape(-1, in_dim)
    m = x2d.shape[0]

    # Pad rows only to a sublane multiple of 8 (<= 7 garbage rows, sliced off
    # later).  The ragged last row *tile* is handled by the grid instead of
    # rounding M up to tile_m (which would copy the activations and waste up
    # to tile_m-1 rows of DMA/MXU/EUP work).
    m8 = _round_up(m, 8)
    x_p = jnp.pad(x2d, ((0, m8 - m), (0, 0))) if m8 != m else x2d

    # Row tile: large enough to amortize the ~0.35us per-grid-step overhead
    # (important on v7x's 3.2 TB/s HBM), capped so the untiled-K tiles fit in
    # scoped VMEM on every generation (v5e 16 MiB default, v7x 64 MiB total).
    tile_m = max(8, (int(tile_m) // 8) * 8)
    isx = jnp.dtype(x_p.dtype).itemsize
    isw = jnp.dtype(w_pack.dtype).itemsize
    iso = jnp.dtype(out_dtype).itemsize
    fixed = 2 * (in_dim * 2 * tn + 2 * tn) * isw            # W + b buffers
    per_row = 2 * (in_dim * isx + tn * iso) + 2 * tn * 4    # x, out tiles + f32 acc
    budget = int(0.75 * vmem_limit_bytes)
    if budget > fixed + 8 * per_row:
        tm_cap = max(8, ((budget - fixed) // per_row) // 8 * 8)
    else:
        # TODO(synk): for very large in_dim add a trailing "arbitrary" K grid
        # axis with an f32 accumulator instead of shrinking tile_m this hard.
        tm_cap = 8
    tm = max(8, min(tile_m, m8, tm_cap))
    n_i = pl.cdiv(m8, tm)

    def _call(single_buffer_weights):
        # W/b block index is constant across the inner row sweep -> single
        # buffering frees in_dim*2*tn*isw bytes of VMEM for a bigger row tile.
        wspec_kwargs = (
            dict(pipeline_mode=pl.Buffered(1)) if single_buffer_weights else {}
        )
        grid_spec = pltpu.PrefetchScalarGridSpec(
            num_scalar_prefetch=0,
            # Column tiles outer, row tiles inner: weights stay VMEM-resident
            # for the whole row sweep; only activations/outputs stream.
            grid=(n_j, n_i),
            in_specs=[
                pl.BlockSpec((tm, in_dim), lambda j, i: (i, 0)),
                pl.BlockSpec((in_dim, 2 * tn), lambda j, i: (0, j), **wspec_kwargs),
                pl.BlockSpec((1, 2 * tn), lambda j, i: (0, j), **wspec_kwargs),
            ],
            out_specs=pl.BlockSpec((tm, tn), lambda j, i: (i, j)),
        )
        return pl.pallas_call(
            gated_trans_kernel,
            out_shape=jax.ShapeDtypeStruct((m8, out_p), out_dtype),
            grid_spec=grid_spec,
            compiler_params=pltpu.CompilerParams(
                dimension_semantics=("parallel", "parallel"),
                vmem_limit_bytes=vmem_limit_bytes,
            ),
        )(x_p, w_pack, b_pack)

    try:
        out = _call(True)
    except Exception:
        # pipeline_mode=pl.Buffered(1) not supported by this JAX version;
        # fall back to default double buffering (correctness unaffected).
        out = _call(False)

    return out[:m, :out_dim].reshape(*lead, out_dim)


def reference(x, wy, by, wg, bg):
    y = jnp.tanh(jnp.einsum("...k,kn->...n", x, wy) + by)
    g = jax.nn.sigmoid(jnp.einsum("...k,kn->...n", x, wg) + bg)
    return y * g


if __name__ == "__main__":
    # Small shapes: batch=2, seq=8, in_dim=32, out_dim=64
    B, S, IN_DIM, OUT_DIM = 2, 8, 32, 64

    key = jax.random.PRNGKey(0)
    kx, kwy, kby, kwg, kbg = jax.random.split(key, 5)

    x = jax.random.normal(kx, (B, S, IN_DIM), dtype=jnp.float32)
    # PyTorch nn.Linear stores [out, in]; here weights are pre-transposed to
    # [in, out] so the kernel computes x @ W directly on the MXU.
    wy = jax.random.normal(kwy, (IN_DIM, OUT_DIM), dtype=jnp.float32) * 0.1
    by = jax.random.normal(kby, (OUT_DIM,), dtype=jnp.float32) * 0.1
    wg = jax.random.normal(kwg, (IN_DIM, OUT_DIM), dtype=jnp.float32) * 0.1
    bg = jax.random.normal(kbg, (OUT_DIM,), dtype=jnp.float32) * 0.1

    # Pack weights ONCE (hoisted out of the per-call path).
    params = pack_gated_trans_params(wy, by, wg, bg)
    jax.block_until_ready((params.w_pack, params.b_pack))

    out = gated_trans(x, params)
    jax.block_until_ready(out)

    ref = reference(x, wy, by, wg, bg)
    assert out.shape == (B, S, OUT_DIM)
    err = float(jnp.max(jnp.abs(out - ref)))
    assert err < 1e-4, f"max abs error {err}"

    print("KERNEL_OK")
</pallas_src>

<mosaic_0001>
module attributes {stable_mosaic.version = 11 : i64} {
  func.func @gated_trans_kernel(%arg0: i32, %arg1: i32, %arg2: memref<16x32xf32, #tpu.memory_space<vmem>>, %arg3: memref<32x128xf32, #tpu.memory_space<vmem>>, %arg4: memref<1x128xf32, #tpu.memory_space<vmem>>, %arg5: memref<16x64xf32, #tpu.memory_space<vmem>>) attributes {dimension_semantics = [#tpu.dimension_semantics<parallel>, #tpu.dimension_semantics<parallel>], iteration_bounds = array<i64: 1, 1>, scalar_prefetch = 0 : i64, scratch_operands = 0 : i64, tpu.core_type = #tpu.core_type<tc>, window_params = [{transform_indices = @transform_0, window_bounds = array<i64: 16, 32>}, {pipeline_mode = #tpu.pipeline_mode<synchronous>, transform_indices = @transform_1, window_bounds = array<i64: 32, 128>}, {pipeline_mode = #tpu.pipeline_mode<synchronous>, transform_indices = @transform_2, window_bounds = array<i64: 1, 128>}, {transform_indices = @transform_3, window_bounds = array<i64: 16, 64>}]} {
    %c0 = arith.constant 0 : index
    %c0_0 = arith.constant 0 : index
    %0 = vector.load %arg2[%c0, %c0_0] : memref<16x32xf32, #tpu.memory_space<vmem>>, vector<16x32xf32>
    %c0_1 = arith.constant 0 : index
    %c0_2 = arith.constant 0 : index
    %1 = vector.load %arg3[%c0_1, %c0_2] : memref<32x128xf32, #tpu.memory_space<vmem>>, vector<32x128xf32>
    %cst = arith.constant dense<0.000000e+00> : vector<16x128xf32>
    %2 = tpu.matmul %0, %1, %cst {dimension_numbers = #tpu.dot_dimension_numbers<[1], [0], [0], [1], [0, 0, 1, 1], [], []>} : vector<16x32xf32>, vector<32x128xf32>, vector<16x128xf32> -> vector<16x128xf32>
    %c0_3 = arith.constant 0 : index
    %c0_4 = arith.constant 0 : index
    %3 = vector.load %arg4[%c0_3, %c0_4] : memref<1x128xf32, #tpu.memory_space<vmem>>, vector<1x128xf32>
    %4 = vector.broadcast %3 : vector<1x128xf32> to vector<16x128xf32>
    %5 = arith.addf %2, %4 : vector<16x128xf32>
    %6 = vector.extract_strided_slice %5 {offsets = [0, 0], sizes = [16, 64], strides = [1, 1]} : vector<16x128xf32> to vector<16x64xf32>
    %7 = math.tanh %6 : vector<16x64xf32>
    %8 = vector.extract_strided_slice %5 {offsets = [0, 64], sizes = [16, 64], strides = [1, 1]} : vector<16x128xf32> to vector<16x64xf32>
    %cst_5 = arith.constant 5.000000e-01 : f32
    %9 = vector.broadcast %cst_5 : f32 to vector<16x64xf32>
    %10 = arith.mulf %9, %8 : vector<16x64xf32>
    %11 = math.tanh %10 : vector<16x64xf32>
    %cst_6 = arith.constant 1.000000e+00 : f32
    %12 = vector.broadcast %cst_6 : f32 to vector<16x64xf32>
    %13 = arith.addf %11, %12 : vector<16x64xf32>
    %cst_7 = arith.constant 5.000000e-01 : f32
    %14 = vector.broadcast %cst_7 : f32 to vector<16x64xf32>
    %15 = arith.mulf %14, %13 : vector<16x64xf32>
    %16 = arith.mulf %7, %15 : vector<16x64xf32>
    %c0_8 = arith.constant 0 : index
    %c0_9 = arith.constant 0 : index
    %17 = vector.load %arg5[%c0_8, %c0_9] : memref<16x64xf32, #tpu.memory_space<vmem>>, vector<16x64xf32>
    tpu.vector_store %arg5[%c0_8, %c0_9], %16 {strides = array<i32>} : memref<16x64xf32, #tpu.memory_space<vmem>>, vector<16x64xf32>,
    return
  }
  func.func @transform_0(%arg0: i32, %arg1: i32) -> (i32, i32) {
    %c0_i32 = arith.constant 0 : i32
    %c0_i32_0 = arith.constant 0 : i32
    return %arg1, %c0_i32 : i32, i32
  }
  func.func @transform_1(%arg0: i32, %arg1: i32) -> (i32, i32) {
    %c0_i32 = arith.constant 0 : i32
    %c0_i32_0 = arith.constant 0 : i32
    return %c0_i32, %arg0 : i32, i32
  }
  func.func @transform_2(%arg0: i32, %arg1: i32) -> (i32, i32) {
    %c0_i32 = arith.constant 0 : i32
    %c0_i32_0 = arith.constant 0 : i32
    return %c0_i32, %arg0 : i32, i32
  }
  func.func @transform_3(%arg0: i32, %arg1: i32) -> (i32, i32) {
    %c0_i32 = arith.constant 0 : i32
    return %arg1, %arg0 : i32, i32
  }
}

module attributes {stable_mosaic.version = 11 : i64} {
  func.func @gated_trans_kernel(%arg0: i32, %arg1: i32, %arg2: memref<16x32xf32, #tpu.memory_space<vmem>>, %arg3: memref<32x128xf32, #tpu.memory_space<vmem>>, %arg4: memref<1x128xf32, #tpu.memory_space<vmem>>, %arg5: memref<16x64xf32, #tpu.memory_space<vmem>>) attributes {dimension_semantics = [#tpu.dimension_semantics<parallel>, #tpu.dimension_semantics<parallel>], iteration_bounds = array<i64: 1, 1>, scalar_prefetch = 0 : i64, scratch_operands = 0 : i64, tpu.core_type = #tpu.core_type<tc>, window_params = [{transform_indices = @transform_0, window_bounds = array<i64: 16, 32>}, {transform_indices = @transform_1, window_bounds = array<i64: 32, 128>}, {transform_indices = @transform_2, window_bounds = array<i64: 1, 128>}, {transform_indices = @transform_3, window_bounds = array<i64: 16, 64>}]} {
    %c0 = arith.constant 0 : index
    %c0_0 = arith.constant 0 : index
    %0 = vector.load %arg2[%c0, %c0_0] : memref<16x32xf32, #tpu.memory_space<vmem>>, vector<16x32xf32>
    %c0_1 = arith.constant 0 : index
    %c0_2 = arith.constant 0 : index
    %1 = vector.load %arg3[%c0_1, %c0_2] : memref<32x128xf32, #tpu.memory_space<vmem>>, vector<32x128xf32>
    %cst = arith.constant dense<0.000000e+00> : vector<16x128xf32>
    %2 = tpu.matmul %0, %1, %cst {dimension_numbers = #tpu.dot_dimension_numbers<[1], [0], [0], [1], [0, 0, 1, 1], [], []>} : vector<16x32xf32>, vector<32x128xf32>, vector<16x128xf32> -> vector<16x128xf32>
    %c0_3 = arith.constant 0 : index
    %c0_4 = arith.constant 0 : index
    %3 = vector.load %arg4[%c0_3, %c0_4] : memref<1x128xf32, #tpu.memory_space<vmem>>, vector<1x128xf32>
    %4 = vector.broadcast %3 : vector<1x128xf32> to vector<16x128xf32>
    %5 = arith.addf %2, %4 : vector<16x128xf32>
    %6 = vector.extract_strided_slice %5 {offsets = [0, 0], sizes = [16, 64], strides = [1, 1]} : vector<16x128xf32> to vector<16x64xf32>
    %7 = math.tanh %6 : vector<16x64xf32>
    %8 = vector.extract_strided_slice %5 {offsets = [0, 64], sizes = [16, 64], strides = [1, 1]} : vector<16x128xf32> to vector<16x64xf32>
    %cst_5 = arith.constant 5.000000e-01 : f32
    %9 = vector.broadcast %cst_5 : f32 to vector<16x64xf32>
    %10 = arith.mulf %9, %8 : vector<16x64xf32>
    %11 = math.tanh %10 : vector<16x64xf32>
    %cst_6 = arith.constant 1.000000e+00 : f32
    %12 = vector.broadcast %cst_6 : f32 to vector<16x64xf32>
    %13 = arith.addf %11, %12 : vector<16x64xf32>
    %cst_7 = arith.constant 5.000000e-01 : f32
    %14 = vector.broadcast %cst_7 : f32 to vector<16x64xf32>
    %15 = arith.mulf %14, %13 : vector<16x64xf32>
    %16 = arith.mulf %7, %15 : vector<16x64xf32>
    %c0_8 = arith.constant 0 : index
    %c0_9 = arith.constant 0 : index
    %17 = vector.load %arg5[%c0_8, %c0_9] : memref<16x64xf32, #tpu.memory_space<vmem>>, vector<16x64xf32>
    tpu.vector_store %arg5[%c0_8, %c0_9], %16 {strides = array<i32>} : memref<16x64xf32, #tpu.memory_space<vmem>>, vector<16x64xf32>,
    return
  }
  func.func @transform_0(%arg0: i32, %arg1: i32) -> (i32, i32) {
    %c0_i32 = arith.constant 0 : i32
    %c0_i32_0 = arith.constant 0 : i32
    return %arg1, %c0_i32 : i32, i32
  }
  func.func @transform_1(%arg0: i32, %arg1: i32) -> (i32, i32) {
    %c0_i32 = arith.constant 0 : i32
    %c0_i32_0 = arith.constant 0 : i32
    return %c0_i32, %arg0 : i32, i32
  }
  func.func @transform_2(%arg0: i32, %arg1: i32) -> (i32, i32) {
    %c0_i32 = arith.constant 0 : i32
    %c0_i32_0 = arith.constant 0 : i32
    return %c0_i32, %arg0 : i32, i32
  }
  func.func @transform_3(%arg0: i32, %arg1: i32) -> (i32, i32) {
    %c0_i32 = arith.constant 0 : i32
    return %arg1, %arg0 : i32, i32
  }
}

</mosaic_0001>

<bundles_post_ra>
// kernel: tpu_custom_call.1
= control target key start
LH: loop header
LB: loop body
LE: loop exit
PB: predicated region body
PF: predicated region fallthrough
CT: control target
= control target key end

     0   :  { %8 = vsyncpa [#allocation3], 0  ;;  %s367_s0 = inlined_call_operand.hbm [shape: f32[16,32], index: 0, kind: input, shape index: {}]   ;;  %s368_s1 = inlined_call_operand.hbm [shape: f32[32,128], index: 1, kind: input, shape index: {}]   ;;  %s369_s2 = inlined_call_operand.vmem [shape: f32[1,128], index: 2, kind: input, shape index: {}]   ;;  %s370_s3 = inlined_call_operand.hbm [shape: f32[16,64], index: 3, kind: output, shape index: {}]  }
   0x1   :  { %9 = vsyncpa [#allocation6], 0 }
   0x2   :  { %10 = vsyncpa [#allocation4], 0  ;;  %s293_s12 = smov [#allocation2]   ;;  %s221_s16 = scalar_lea.hbm %s367_s0, 256 }
   0x3   :  { %s16_s13 = sshll.u32 %s293_s12, 4  ;;  %p222_p0 = scmp.ne.s32.totalorder %s367_s0, %s221_s16  ;;  %s17_s13 = int_to_ptr.vmem [resolvable:$true] %s16_s13 }
   0x4   :  { %p225_p1 = scmp.lt.u32.totalorder %s221_s16, %s367_s0 }
   0x6   :  { %p227_p2 = pnand %p225_p1, %p222_p0 }
   0x8   :  { %230 = shalt.err (!%p227_p2)
}
   0x9   :  { %s231_s21 = scalar_lea.vmem %s17_s13, 256  ;;  %p236_p4 = scmp.lt.s32.totalorder %s17_s13, %s17_s13 }
   0xa   :  { %p232_p3 = scmp.ne.s32.totalorder %s17_s13, %s231_s21  ;;  %p237_p5 = scmp.lt.s32.totalorder %s231_s21, %s231_s21 }
   0xc   :  { %p238_p6 = por %p237_p5, %p236_p4 }
   0xe   :  { %p239_p7 = pnand %p238_p6, %p232_p3 }
  0x10   :  { %242 = shalt.err (!%p239_p7)
}
  0x11   :  { %s294_s22 = smov 128   ;;  %s295_s23 = smov 8  }
  0x12   :  { %22 = dma.hbm_to_vmem [thread:$0]  %s367_s0, 256, %s17_s13, [#allocation3], %s294_s22, %s294_s22, %s295_s23  }
  0x13   :  { %s296_s26 = smov [#allocation5]   ;;  %s243_s30 = scalar_lea.hbm %s368_s1, 512 }
  0x14   :  { %s28_s27 = sshll.u32 %s296_s26, 4  ;;  %p244_p8 = scmp.ne.s32.totalorder %s368_s1, %s243_s30  ;;  %s29_s27 = int_to_ptr.vmem [resolvable:$true] %s28_s27 }
  0x15   :  { %p247_p9 = scmp.lt.u32.totalorder %s243_s30, %s368_s1 }
  0x17   :  { %p249_p10 = pnand %p247_p9, %p244_p8 }
  0x19   :  { %252 = shalt.err (!%p249_p10)
}
  0x1a   :  { %s253_s8 = scalar_lea.vmem %s29_s27, 512  ;;  %p258_p12 = scmp.lt.s32.totalorder %s29_s27, %s29_s27 }
  0x1b   :  { %p254_p11 = scmp.ne.s32.totalorder %s29_s27, %s253_s8  ;;  %p259_p13 = scmp.lt.s32.totalorder %s253_s8, %s253_s8 }
  0x1d   :  { %p260_p0 = por %p259_p13, %p258_p12 }
  0x1f   :  { %p261_p1 = pnand %p260_p0, %p254_p11 }
  0x21   :  { %264 = shalt.err (!%p261_p1)
}
  0x22   :  { %34 = dma.hbm_to_vmem [thread:$0]  %s368_s1, 512, %s29_s27, [#allocation6], %s294_s22, %s294_s22, %s295_s23  }
  0x23   :  { %287 = dma.done.wait [#allocation3], 256  }
  0x24   :  { %288 = vsyncadd [#allocation3], 4294967040 }
  0x25   :  { %289 = dma.done.wait [#allocation6], 512  }
  0x26   :  { %290 = vsyncadd [#allocation6], 4294966784  ;;  %vm56_vm0 = vcmask 261120   ;;  %v45_v0 = vld [vmem:[#allocation5] sm:$0xff]  ;;  %v46_v1 = vld [vmem:[#allocation5 + $0x8] sm:$0xff]  ;;  %s297_s11 = smov 64  }
  0x27   :  { %v47_v2 = vld [vmem:[#allocation5 + $0x10] sm:$0xff]  ;;  %v199_v3 = vpack.c.bf16 %v46_v1, %v45_v0  ;;  %v48_v4 = vld [vmem:[#allocation5 + $0x18] sm:$0xff]  ;;  %vm158_vm1 = vcmask 523264  }
  0x28   :  { %v43_v5 = vld [vmem:[#allocation2] sm:$0xff]  ;;  %v203_v6 = vpack.c.bf16 %v48_v4, %v47_v2  ;;  %v44_v7 = vld [vmem:[#allocation2 + $0x8] sm:$0xff] }
  0x29   :  { %196 = vmatprep.mubr.msk.f32.mxu0 %vm56_vm0, %v43_v5  ;;  %200 = vmatprep.subr.bf16.mxu0 %v199_v3  ;;  %v179_v8 = vld [vmem:[%s369_s2] ss:$0 sm:$0xff]  ;;  %s298_s2 = smov [#allocation7]  }
  0x2a   :  { %202 = vmatpush3.bf16.msra.mxu0 %v199_v3  ;;  %s166_s12 = sshll.u32 %s298_s2, 4  ;;  %s167_s12 = int_to_ptr.vmem [resolvable:$true] %s166_s12 }
  0x2b   :  { %204 = vmatprep.subr.bf16.mxu0 %v203_v6  ;;  %s265_s13 = scalar_lea.vmem %s167_s12, 256  ;;  %p270_p3 = scmp.lt.s32.totalorder %s167_s12, %s167_s12 }
  0x2c   :  { %p266_p2 = scmp.ne.s32.totalorder %s167_s12, %s265_s13  ;;  %p271_p4 = scmp.lt.s32.totalorder %s265_s13, %s265_s13 }
  0x2e   :  { %206 = vmatpush3.bf16.msra.mxu0 %v203_v6  ;;  %p272_p5 = por %p271_p4, %p270_p3 }
  0x30   :  { %p273_p6 = pnand %p272_p5, %p266_p2 }
  0x31   :  { %197 = vmatmul.mubr.msk.f32.vlgmr.msra.gmra.mrb[0].mxu0 %vm56_vm0, %v44_v7 }
 0x104   :  { %v198_v9 = vpop.f32.mrb[0].mxu0 }
 0x105   :  { %v135_v10 = vadd.f32 %v198_v9, %v179_v8  ;;  %v129_v11 = vpop.f32.mrb[1].mxu0 }
 0x106   :  { %v130_v12 = vadd.f32 %v179_v8, %v129_v11 }
 0x107   :  { %v141_v13 = vmul.f32 0.5, %v135_v10 }
 0x108   :  { %v140_v14 = vmul.f32 0.5, %v130_v12 }
 0x109   :  { %213 = vtanh.f32 %v141_v13 }
 0x10a   :  { %215 = vtanh.f32 %v140_v14 }
 0x10b   :  { %217 = vtanh.f32 %v130_v12 }
 0x10c   :  { %219 = vtanh.f32 %v135_v10 }
 0x113   :  { %v214_v15 = vpop.eup %213 }
 0x114   :  { %v216_v16 = vpop.eup %215  ;;  %v145_v19 = vadd.f32 1.0, %v214_v15 }
 0x115   :  { %v144_v17 = vadd.f32 1.0, %v216_v16  ;;  %v218_v21 = vpop.eup %217 }
 0x116   :  { %v147_v20 = vmul.f32 0.5, %v145_v19  ;;  %v220_v24 = vpop.eup %219 }
 0x117   :  { %v146_v18 = vmul.f32 0.5, %v144_v17 }
 0x119   :  { %150 = vrot.lane.b32.xlu0 %v146_v18, %s297_s11 }
 0x11d   :  { %152 = vrot.lane.b32.xlu0 %v147_v20, %s297_s11 }
 0x18b   :  { %v151_v22 = vpop.permute.xlu0 %150 }
 0x18c   :  { %v156_v23 = vmul.f32 %v218_v21, %v151_v22 }
 0x18e   :  { %159 = vst.msk [vmem:[#allocation7] sm:$0xff] %vm158_vm1, %v156_v23 }
 0x18f   :  { %v153_v25 = vpop.permute.xlu0 %152 }
 0x190   :  { %v157_v26 = vmul.f32 %v220_v24, %v153_v25 }
 0x192   :  { %160 = vst.msk [vmem:[#allocation7 + $0x8] sm:$0xff] %vm158_vm1, %v157_v26 }
 0x193   :  { %276 = shalt.err (!%p273_p6)
}
 0x194   :  { %s277_s16 = scalar_lea.hbm %s370_s3, 256 }
 0x195   :  { %p278_p7 = scmp.ne.s32.totalorder %s370_s3, %s277_s16  ;;  %p281_p8 = scmp.lt.u32.totalorder %s277_s16, %s370_s3 }
 0x197   :  { %p283_p9 = pnand %p281_p8, %p278_p7 }
 0x199   :  { %286 = shalt.err (!%p283_p9)
}
 0x19a   :  { %172 = dma.vmem_to_hbm [thread:$0]  %s167_s12, 256, %s370_s3, [#allocation4], %s294_s22, %s294_s22, %s295_s23  }
 0x19b   :  { %291 = dma.done.wait [#allocation4], 256  }
 0x19c   :  { %292 = vsyncadd [#allocation4], 4294967040 }
 0x19d   :  { %176 = vsyncpa [#allocation3], 1 }
 0x19e   :  { %177 = vsyncpa [#allocation6], 1 }
 0x19f   :  { %178 = vsyncpa [#allocation4], 1 }

// kernel: tpu_custom_call.1
= control target key start
LH: loop header
LB: loop body
LE: loop exit
PB: predicated region body
PF: predicated region fallthrough
CT: control target
= control target key end

     0   :  { %8 = vsyncpa [#allocation3], 0  ;;  %s367_s0 = inlined_call_operand.hbm [shape: f32[16,32], index: 0, kind: input, shape index: {}]   ;;  %s368_s1 = inlined_call_operand.hbm [shape: f32[32,128], index: 1, kind: input, shape index: {}]   ;;  %s369_s2 = inlined_call_operand.vmem [shape: f32[1,128], index: 2, kind: input, shape index: {}]   ;;  %s370_s3 = inlined_call_operand.hbm [shape: f32[16,64], index: 3, kind: output, shape index: {}]  }
   0x1   :  { %9 = vsyncpa [#allocation6], 0 }
   0x2   :  { %10 = vsyncpa [#allocation4], 0  ;;  %s293_s12 = smov [#allocation2]   ;;  %s221_s16 = scalar_lea.hbm %s367_s0, 256 }
   0x3   :  { %s16_s13 = sshll.u32 %s293_s12, 4  ;;  %p222_p0 = scmp.ne.s32.totalorder %s367_s0, %s221_s16  ;;  %s17_s13 = int_to_ptr.vmem [resolvable:$true] %s16_s13 }
   0x4   :  { %p225_p1 = scmp.lt.u32.totalorder %s221_s16, %s367_s0 }
   0x6   :  { %p227_p2 = pnand %p225_p1, %p222_p0 }
   0x8   :  { %230 = shalt.err (!%p227_p2)
}
   0x9   :  { %s231_s21 = scalar_lea.vmem %s17_s13, 256  ;;  %p236_p4 = scmp.lt.s32.totalorder %s17_s13, %s17_s13 }
   0xa   :  { %p232_p3 = scmp.ne.s32.totalorder %s17_s13, %s231_s21  ;;  %p237_p5 = scmp.lt.s32.totalorder %s231_s21, %s231_s21 }
   0xc   :  { %p238_p6 = por %p237_p5, %p236_p4 }
   0xe   :  { %p239_p7 = pnand %p238_p6, %p232_p3 }
  0x10   :  { %242 = shalt.err (!%p239_p7)
}
  0x11   :  { %s294_s22 = smov 128   ;;  %s295_s23 = smov 8  }
  0x12   :  { %22 = dma.hbm_to_vmem [thread:$0]  %s367_s0, 256, %s17_s13, [#allocation3], %s294_s22, %s294_s22, %s295_s23  }
  0x13   :  { %s296_s26 = smov [#allocation5]   ;;  %s243_s30 = scalar_lea.hbm %s368_s1, 512 }
  0x14   :  { %s28_s27 = sshll.u32 %s296_s26, 4  ;;  %p244_p8 = scmp.ne.s32.totalorder %s368_s1, %s243_s30  ;;  %s29_s27 = int_to_ptr.vmem [resolvable:$true] %s28_s27 }
  0x15   :  { %p247_p9 = scmp.lt.u32.totalorder %s243_s30, %s368_s1 }
  0x17   :  { %p249_p10 = pnand %p247_p9, %p244_p8 }
  0x19   :  { %252 = shalt.err (!%p249_p10)
}
  0x1a   :  { %s253_s8 = scalar_lea.vmem %s29_s27, 512  ;;  %p258_p12 = scmp.lt.s32.totalorder %s29_s27, %s29_s27 }
  0x1b   :  { %p254_p11 = scmp.ne.s32.totalorder %s29_s27, %s253_s8  ;;  %p259_p13 = scmp.lt.s32.totalorder %s253_s8, %s253_s8 }
  0x1d   :  { %p260_p0 = por %p259_p13, %p258_p12 }
  0x1f   :  { %p261_p1 = pnand %p260_p0, %p254_p11 }
  0x21   :  { %264 = shalt.err (!%p261_p1)
}
  0x22   :  { %34 = dma.hbm_to_vmem [thread:$0]  %s368_s1, 512, %s29_s27, [#allocation6], %s294_s22, %s294_s22, %s295_s23  }
  0x23   :  { %287 = dma.done.wait [#allocation3], 256  }
  0x24   :  { %288 = vsyncadd [#allocation3], 4294967040 }
  0x25   :  { %289 = dma.done.wait [#allocation6], 512  }
  0x26   :  { %290 = vsyncadd [#allocation6], 4294966784  ;;  %vm56_vm0 = vcmask 261120   ;;  %v45_v0 = vld [vmem:[#allocation5] sm:$0xff]  ;;  %v46_v1 = vld [vmem:[#allocation5 + $0x8] sm:$0xff]  ;;  %s297_s11 = smov 64  }
  0x27   :  { %v47_v2 = vld [vmem:[#allocation5 + $0x10] sm:$0xff]  ;;  %v199_v3 = vpack.c.bf16 %v46_v1, %v45_v0  ;;  %v48_v4 = vld [vmem:[#allocation5 + $0x18] sm:$0xff]  ;;  %vm158_vm1 = vcmask 523264  }
  0x28   :  { %v43_v5 = vld [vmem:[#allocation2] sm:$0xff]  ;;  %v203_v6 = vpack.c.bf16 %v48_v4, %v47_v2  ;;  %v44_v7 = vld [vmem:[#allocation2 + $0x8] sm:$0xff] }
  0x29   :  { %196 = vmatprep.mubr.msk.f32.mxu0 %vm56_vm0, %v43_v5  ;;  %200 = vmatprep.subr.bf16.mxu0 %v199_v3  ;;  %v179_v8 = vld [vmem:[%s369_s2] ss:$0 sm:$0xff]  ;;  %s298_s2 = smov [#allocation7]  }
  0x2a   :  { %202 = vmatpush3.bf16.msra.mxu0 %v199_v3  ;;  %s166_s12 = sshll.u32 %s298_s2, 4  ;;  %s167_s12 = int_to_ptr.vmem [resolvable:$true] %s166_s12 }
  0x2b   :  { %204 = vmatprep.subr.bf16.mxu0 %v203_v6  ;;  %s265_s13 = scalar_lea.vmem %s167_s12, 256  ;;  %p270_p3 = scmp.lt.s32.totalorder %s167_s12, %s167_s12 }
  0x2c   :  { %p266_p2 = scmp.ne.s32.totalorder %s167_s12, %s265_s13  ;;  %p271_p4 = scmp.lt.s32.totalorder %s265_s13, %s265_s13 }
  0x2e   :  { %206 = vmatpush3.bf16.msra.mxu0 %v203_v6  ;;  %p272_p5 = por %p271_p4, %p270_p3 }
  0x30   :  { %p273_p6 = pnand %p272_p5, %p266_p2 }
  0x31   :  { %197 = vmatmul.mubr.msk.f32.vlgmr.msra.gmra.mrb[0].mxu0 %vm56_vm0, %v44_v7 }
 0x104   :  { %v198_v9 = vpop.f32.mrb[0].mxu0 }
 0x105   :  { %v135_v10 = vadd.f32 %v198_v9, %v179_v8  ;;  %v129_v11 = vpop.f32.mrb[1].mxu0 }
 0x106   :  { %v130_v12 = vadd.f32 %v179_v8, %v129_v11 }
 0x107   :  { %v141_v13 = vmul.f32 0.5, %v135_v10 }
 0x108   :  { %v140_v14 = vmul.f32 0.5, %v130_v12 }
 0x109   :  { %213 = vtanh.f32 %v141_v13 }
 0x10a   :  { %215 = vtanh.f32 %v140_v14 }
 0x10b   :  { %217 = vtanh.f32 %v130_v12 }
 0x10c   :  { %219 = vtanh.f32 %v135_v10 }
 0x113   :  { %v214_v15 = vpop.eup %213 }
 0x114   :  { %v216_v16 = vpop.eup %215  ;;  %v145_v19 = vadd.f32 1.0, %v214_v15 }
 0x115   :  { %v144_v17 = vadd.f32 1.0, %v216_v16  ;;  %v218_v21 = vpop.eup %217 }
 0x116   :  { %v147_v20 = vmul.f32 0.5, %v145_v19  ;;  %v220_v24 = vpop.eup %219 }
 0x117   :  { %v146_v18 = vmul.f32 0.5, %v144_v17 }
 0x119   :  { %150 = vrot.lane.b32.xlu0 %v146_v18, %s297_s11 }
 0x11d   :  { %152 = vrot.lane.b32.xlu0 %v147_v20, %s297_s11 }
 0x18b   :  { %v151_v22 = vpop.permute.xlu0 %150 }
 0x18c   :  { %v156_v23 = vmul.f32 %v218_v21, %v151_v22 }
 0x18e   :  { %159 = vst.msk [vmem:[#allocation7] sm:$0xff] %vm158_vm1, %v156_v23 }
 0x18f   :  { %v153_v25 = vpop.permute.xlu0 %152 }
 0x190   :  { %v157_v26 = vmul.f32 %v220_v24, %v153_v25 }
 0x192   :  { %160 = vst.msk [vmem:[#allocation7 + $0x8] sm:$0xff] %vm158_vm1, %v157_v26 }
 0x193   :  { %276 = shalt.err (!%p273_p6)
}
 0x194   :  { %s277_s16 = scalar_lea.hbm %s370_s3, 256 }
 0x195   :  { %p278_p7 = scmp.ne.s32.totalorder %s370_s3, %s277_s16  ;;  %p281_p8 = scmp.lt.u32.totalorder %s277_s16, %s370_s3 }
 0x197   :  { %p283_p9 = pnand %p281_p8, %p278_p7 }
 0x199   :  { %286 = shalt.err (!%p283_p9)
}
 0x19a   :  { %172 = dma.vmem_to_hbm [thread:$0]  %s167_s12, 256, %s370_s3, [#allocation4], %s294_s22, %s294_s22, %s295_s23  }
 0x19b   :  { %291 = dma.done.wait [#allocation4], 256  }
 0x19c   :  { %292 = vsyncadd [#allocation4], 4294967040 }
 0x19d   :  { %176 = vsyncpa [#allocation3], 1 }
 0x19e   :  { %177 = vsyncpa [#allocation6], 1 }
 0x19f   :  { %178 = vsyncpa [#allocation4], 1 }

</bundles_post_ra>
